<compile_context>
chip_gen: v7x
topology: tpu7x:2x2x1
jax: 0.10.0
libtpu: 0.0.40
codegen_flags: <defaults>
</compile_context>

<pallas_src>
import functools

import jax
import jax.numpy as jnp
from jax.experimental import pallas as pl
from jax.experimental.pallas import tpu as pltpu


def _round_up(x, m):
    return (x + m - 1) // m * m


# ----------------------------- Pallas kernel ------------------------------- #
def mlp_critic_kernel(x_ref, w1_ref, b1_ref, w2_ref, b2_ref, w3_ref, b3_ref,
                      ln_g_ref, ln_b_ref, v_ref, *, hidden_true, eps,
                      matmul_dtype):
    # x: (TILE_N, D_pad) activation tile; rows on sublanes, features on lanes.
    x = x_ref[...].astype(matmul_dtype)

    # fc1 + ReLU (f32 accumulation on the MXU).
    h1 = jnp.dot(x, w1_ref[...].astype(matmul_dtype),
                 preferred_element_type=jnp.float32) + b1_ref[...]
    h1 = jnp.maximum(h1, 0.0)

    # LayerNorm over the TRUE hidden width with fused single-sweep stats:
    #   mean = E[h1],  var = E[h1^2] - mean^2   (one pass over h1 per stat).
    # Padded hidden lanes are exactly 0 (zero-padded w1 columns / b1), so they
    # contribute nothing to either sum; dividing by hidden_true keeps the
    # statistics identical to nn.LayerNorm on the unpadded features.
    inv_h = 1.0 / hidden_true
    mean = jnp.sum(h1, axis=-1, keepdims=True) * inv_h
    mean_sq = jnp.sum(h1 * h1, axis=-1, keepdims=True) * inv_h
    var = jnp.maximum(mean_sq - mean * mean, 0.0)
    hn = (h1 - mean) * jax.lax.rsqrt(var + eps)
    hn = hn * ln_g_ref[...] + ln_b_ref[...]      # padded lanes: g = b = 0 -> 0

    # fc2 + ReLU.
    h2 = jnp.dot(hn.astype(matmul_dtype), w2_ref[...].astype(matmul_dtype),
                 preferred_element_type=jnp.float32) + b2_ref[...]
    h2 = jnp.maximum(h2, 0.0)

    # fc3 as (1,H) . (TILE_N,H)^T so the value vector comes out lane-dense as
    # (1, TILE_N) -> unmasked vector stores.  The M=1 matmul cost is
    # negligible next to fc1/fc2 and avoids a (TILE_N,1) masked-store column.
    v = jax.lax.dot_general(
        w3_ref[...].astype(matmul_dtype), h2.astype(matmul_dtype),
        dimension_numbers=(((1,), (1,)), ((), ())),
        preferred_element_type=jnp.float32) + b3_ref[...]
    v_ref[...] = v.astype(v_ref.dtype)


# ------------------------------ Pallas wrapper ------------------------------ #
def mlp_critic_pallas(inputs, params, *, tile_rows=512,
                      matmul_dtype=jnp.float32):
    """inputs: (N, D_in) f32.  Returns v: (N, 1) f32."""
    n, d_in = inputs.shape
    hidden = params["w1"].shape[1]

    d_pad = _round_up(d_in, 128)
    h_pad = _round_up(hidden, 128)
    tile_n = min(tile_rows, _round_up(n, 8))
    n_pad = _round_up(n, tile_n)
    num_tiles = n_pad // tile_n

    f32 = jnp.float32
    # Zero-pad features / rows so every block is (8, 128) aligned.  Zero
    # padding is exact: padded input columns hit zero w1 rows; padded hidden
    # columns stay identically zero through ReLU / LayerNorm / fc2 / fc3.
    x = jnp.pad(inputs.astype(f32), ((0, n_pad - n), (0, d_pad - d_in)))
    w1 = jnp.pad(params["w1"].astype(f32),
                 ((0, d_pad - d_in), (0, h_pad - hidden)))
    b1 = jnp.pad(params["b1"].reshape(1, hidden).astype(f32),
                 ((0, 0), (0, h_pad - hidden)))
    w2 = jnp.pad(params["w2"].astype(f32),
                 ((0, h_pad - hidden), (0, h_pad - hidden)))
    b2 = jnp.pad(params["b2"].reshape(1, hidden).astype(f32),
                 ((0, 0), (0, h_pad - hidden)))
    w3 = jnp.pad(params["w3"].reshape(1, hidden).astype(f32),   # (H,1) -> (1,H)
                 ((0, 0), (0, h_pad - hidden)))
    b3 = params["b3"].reshape(1, 1).astype(f32)
    ln_g = jnp.pad(params["ln_g"].reshape(1, hidden).astype(f32),
                   ((0, 0), (0, h_pad - hidden)))
    ln_b = jnp.pad(params["ln_b"].reshape(1, hidden).astype(f32),
                   ((0, 0), (0, h_pad - hidden)))

    kernel = functools.partial(
        mlp_critic_kernel, hidden_true=hidden, eps=1e-5,
        matmul_dtype=matmul_dtype)

    # Weights/biases: constant block index -> stay resident in VMEM.
    def resident(shape):
        return pl.BlockSpec(shape, lambda i: (0, 0))

    flops = 2 * n_pad * (d_pad * h_pad + h_pad * h_pad + h_pad)
    bytes_accessed = 4 * (n_pad * d_pad + n_pad
                          + d_pad * h_pad + h_pad * h_pad + 4 * h_pad + 2)

    out = pl.pallas_call(
        kernel,
        out_shape=jax.ShapeDtypeStruct((num_tiles, 1, tile_n), jnp.float32),
        grid=(num_tiles,),
        in_specs=[
            pl.BlockSpec((tile_n, d_pad), lambda i: (i, 0)),   # x (streamed)
            resident((d_pad, h_pad)),                          # w1
            resident((1, h_pad)),                              # b1
            resident((h_pad, h_pad)),                          # w2
            resident((1, h_pad)),                              # b2
            resident((1, h_pad)),                              # w3 (row vector)
            resident((1, 1)),                                  # b3
            resident((1, h_pad)),                              # ln gamma
            resident((1, h_pad)),                              # ln beta
        ],
        out_specs=pl.BlockSpec((None, 1, tile_n), lambda i: (i, 0, 0)),
        compiler_params=pltpu.CompilerParams(
            dimension_semantics=("parallel",)),
        cost_estimate=pl.CostEstimate(
            flops=flops, transcendentals=n_pad,
            bytes_accessed=bytes_accessed),
    )(x, w1, b1, w2, b2, w3, b3, ln_g, ln_b)

    return out.reshape(n_pad)[:n].reshape(n, 1)


# --------------------------- module-level wrapper --------------------------- #
def build_inputs(obs, last_actions):
    """Mirror of BaseCritic._build_inputs for
       critic_inputs = ['independent_obs', 'last_action', 'agent_id']."""
    b, a, _ = obs.shape
    agent_id = jnp.broadcast_to(jnp.eye(a, dtype=obs.dtype), (b, a, a))
    inputs = jnp.concatenate(
        [obs.reshape(b, a, -1), last_actions.reshape(b, a, -1), agent_id],
        axis=-1)
    return inputs.reshape(b * a, -1)


def mlp_critic_forward(data, params, **kwargs):
    """Returns (v, None) with v of shape (b, a, 1) — same as the PyTorch module."""
    b, a, _ = data["obs"].shape
    inputs = build_inputs(data["obs"], data["last_actions"])
    v = mlp_critic_pallas(inputs, params, **kwargs)
    # torch.numel(v) == b*a here, so the repeat branch is never taken.
    return v.reshape(b, a, -1), None


def init_params(key, input_dim, hidden_dim):
    """Synthetic parameter init; shapes match the nn.Linear / nn.LayerNorm
    layers.  Weights stored (in, out); biases stored 1-D like PyTorch."""
    ks = jax.random.split(key, 8)
    s1 = 1.0 / jnp.sqrt(jnp.float32(input_dim))
    s2 = 1.0 / jnp.sqrt(jnp.float32(hidden_dim))
    return {
        "w1": jax.random.normal(ks[0], (input_dim, hidden_dim), jnp.float32) * s1,
        "b1": jax.random.normal(ks[1], (hidden_dim,), jnp.float32) * 0.05,
        "w2": jax.random.normal(ks[2], (hidden_dim, hidden_dim), jnp.float32) * s2,
        "b2": jax.random.normal(ks[3], (hidden_dim,), jnp.float32) * 0.05,
        "w3": jax.random.normal(ks[4], (hidden_dim, 1), jnp.float32) * s2,
        "b3": jax.random.normal(ks[5], (1,), jnp.float32) * 0.05,
        "ln_g": 1.0 + jax.random.normal(ks[6], (hidden_dim,), jnp.float32) * 0.05,
        "ln_b": jax.random.normal(ks[7], (hidden_dim,), jnp.float32) * 0.05,
    }


# ---------------------- pure-JAX reference for checking --------------------- #
def mlp_critic_ref(inputs, p):
    h1 = jnp.maximum(inputs @ p["w1"] + p["b1"], 0.0)
    mean = jnp.mean(h1, axis=-1, keepdims=True)
    var = jnp.mean((h1 - mean) ** 2, axis=-1, keepdims=True)
    hn = (h1 - mean) * jax.lax.rsqrt(var + 1e-5) * p["ln_g"] + p["ln_b"]
    h2 = jnp.maximum(hn @ p["w2"] + p["b2"], 0.0)
    return h2 @ p["w3"] + p["b3"]


if __name__ == "__main__":
    # Small, module-consistent shapes.
    batch, n_agents, obs_shape, n_actions, hidden_dim = 2, 4, 16, 5, 32
    input_dim = obs_shape + n_actions + n_agents  # obs + last_action + agent_id

    key = jax.random.PRNGKey(0)
    k_obs, k_act, k_par = jax.random.split(key, 3)

    obs = jax.random.normal(k_obs, (batch, n_agents, obs_shape), jnp.float32)
    last_actions = jax.nn.one_hot(
        jax.random.randint(k_act, (batch, n_agents), 0, n_actions), n_actions,
        dtype=jnp.float32)

    params = init_params(k_par, input_dim, hidden_dim)
    data = {"obs": obs, "last_actions": last_actions}

    v, _ = mlp_critic_forward(data, params)   # f32 matmuls; pass
                                              # matmul_dtype=jnp.bfloat16 on
                                              # v6e/v7x for the fast MXU path.
    v = jax.block_until_ready(v)

    # sanity check vs pure-JAX reference
    v_ref = mlp_critic_ref(build_inputs(obs, last_actions), params).reshape(
        batch, n_agents, 1)
    assert v.shape == (batch, n_agents, 1)
    assert jnp.allclose(v, v_ref, atol=1e-4, rtol=1e-4), (
        float(jnp.max(jnp.abs(v - v_ref))))

    print("KERNEL_OK")
</pallas_src>

<mosaic_0001>
module attributes {stable_mosaic.version = 11 : i64} {
  func.func @mlp_critic_kernel(%arg0: i32, %arg1: memref<8x128xf32, #tpu.memory_space<vmem>>, %arg2: memref<128x128xf32, #tpu.memory_space<vmem>>, %arg3: memref<1x128xf32, #tpu.memory_space<vmem>>, %arg4: memref<128x128xf32, #tpu.memory_space<vmem>>, %arg5: memref<1x128xf32, #tpu.memory_space<vmem>>, %arg6: memref<1x128xf32, #tpu.memory_space<vmem>>, %arg7: memref<1x1xf32, #tpu.memory_space<vmem>>, %arg8: memref<1x128xf32, #tpu.memory_space<vmem>>, %arg9: memref<1x128xf32, #tpu.memory_space<vmem>>, %arg10: memref<1x1x8xf32, #tpu.memory_space<vmem>>) attributes {dimension_semantics = [#tpu.dimension_semantics<parallel>], iteration_bounds = array<i64: 1>, scalar_prefetch = 0 : i64, scratch_operands = 0 : i64, tpu.core_type = #tpu.core_type<tc>, window_params = [{transform_indices = @transform_0, window_bounds = array<i64: 8, 128>}, {pipeline_mode = #tpu.pipeline_mode<synchronous>, transform_indices = @transform_1, window_bounds = array<i64: 128, 128>}, {pipeline_mode = #tpu.pipeline_mode<synchronous>, transform_indices = @transform_2, window_bounds = array<i64: 1, 128>}, {pipeline_mode = #tpu.pipeline_mode<synchronous>, transform_indices = @transform_3, window_bounds = array<i64: 128, 128>}, {pipeline_mode = #tpu.pipeline_mode<synchronous>, transform_indices = @transform_4, window_bounds = array<i64: 1, 128>}, {pipeline_mode = #tpu.pipeline_mode<synchronous>, transform_indices = @transform_5, window_bounds = array<i64: 1, 128>}, {pipeline_mode = #tpu.pipeline_mode<synchronous>, transform_indices = @transform_6, window_bounds = array<i64: 1, 1>}, {pipeline_mode = #tpu.pipeline_mode<synchronous>, transform_indices = @transform_7, window_bounds = array<i64: 1, 128>}, {pipeline_mode = #tpu.pipeline_mode<synchronous>, transform_indices = @transform_8, window_bounds = array<i64: 1, 128>}, {transform_indices = @transform_9, window_bounds = array<i64: 1, 1, 8>}]} {
    %c0 = arith.constant 0 : index
    %c0_0 = arith.constant 0 : index
    %0 = vector.load %arg1[%c0, %c0_0] : memref<8x128xf32, #tpu.memory_space<vmem>>, vector<8x128xf32>
    %c0_1 = arith.constant 0 : index
    %c0_2 = arith.constant 0 : index
    %1 = vector.load %arg2[%c0_1, %c0_2] : memref<128x128xf32, #tpu.memory_space<vmem>>, vector<128x128xf32>
    %cst = arith.constant dense<0.000000e+00> : vector<8x128xf32>
    %2 = tpu.matmul %0, %1, %cst {dimension_numbers = #tpu.dot_dimension_numbers<[1], [0], [0], [1], [0, 0, 1, 1], [], []>} : vector<8x128xf32>, vector<128x128xf32>, vector<8x128xf32> -> vector<8x128xf32>
    %c0_3 = arith.constant 0 : index
    %c0_4 = arith.constant 0 : index
    %3 = vector.load %arg3[%c0_3, %c0_4] : memref<1x128xf32, #tpu.memory_space<vmem>>, vector<1x128xf32>
    %4 = vector.broadcast %3 : vector<1x128xf32> to vector<8x128xf32>
    %5 = arith.addf %2, %4 : vector<8x128xf32>
    %cst_5 = arith.constant 0.000000e+00 : f32
    %6 = vector.broadcast %cst_5 : f32 to vector<8x128xf32>
    %7 = arith.maximumf %5, %6 : vector<8x128xf32>
    %cst_6 = arith.constant dense<0.000000e+00> : vector<8xf32>
    %8 = vector.multi_reduction <add>, %7, %cst_6 [1] : vector<8x128xf32> to vector<8xf32>
    %9 = vector.shape_cast %8 : vector<8xf32> to vector<8x1xf32>
    %cst_7 = arith.constant 3.125000e-02 : f32
    %10 = vector.broadcast %cst_7 : f32 to vector<8x1xf32>
    %11 = arith.mulf %9, %10 : vector<8x1xf32>
    %12 = arith.mulf %7, %7 : vector<8x128xf32>
    %cst_8 = arith.constant dense<0.000000e+00> : vector<8xf32>
    %13 = vector.multi_reduction <add>, %12, %cst_8 [1] : vector<8x128xf32> to vector<8xf32>
    %14 = vector.shape_cast %13 : vector<8xf32> to vector<8x1xf32>
    %cst_9 = arith.constant 3.125000e-02 : f32
    %15 = vector.broadcast %cst_9 : f32 to vector<8x1xf32>
    %16 = arith.mulf %14, %15 : vector<8x1xf32>
    %17 = arith.mulf %11, %11 : vector<8x1xf32>
    %18 = arith.subf %16, %17 : vector<8x1xf32>
    %cst_10 = arith.constant 0.000000e+00 : f32
    %19 = vector.broadcast %cst_10 : f32 to vector<8x1xf32>
    %20 = arith.maximumf %18, %19 : vector<8x1xf32>
    %21 = vector.broadcast %11 : vector<8x1xf32> to vector<8x128xf32>
    %22 = arith.subf %7, %21 : vector<8x128xf32>
    %cst_11 = arith.constant 9.99999974E-6 : f32
    %23 = vector.broadcast %cst_11 : f32 to vector<8x1xf32>
    %24 = arith.addf %20, %23 : vector<8x1xf32>
    %25 = math.rsqrt %24 : vector<8x1xf32>
    %26 = vector.broadcast %25 : vector<8x1xf32> to vector<8x128xf32>
    %27 = arith.mulf %22, %26 : vector<8x128xf32>
    %c0_12 = arith.constant 0 : index
    %c0_13 = arith.constant 0 : index
    %28 = vector.load %arg8[%c0_12, %c0_13] : memref<1x128xf32, #tpu.memory_space<vmem>>, vector<1x128xf32>
    %29 = vector.broadcast %28 : vector<1x128xf32> to vector<8x128xf32>
    %30 = arith.mulf %27, %29 : vector<8x128xf32>
    %c0_14 = arith.constant 0 : index
    %c0_15 = arith.constant 0 : index
    %31 = vector.load %arg9[%c0_14, %c0_15] : memref<1x128xf32, #tpu.memory_space<vmem>>, vector<1x128xf32>
    %32 = vector.broadcast %31 : vector<1x128xf32> to vector<8x128xf32>
    %33 = arith.addf %30, %32 : vector<8x128xf32>
    %c0_16 = arith.constant 0 : index
    %c0_17 = arith.constant 0 : index
    %34 = vector.load %arg4[%c0_16, %c0_17] : memref<128x128xf32, #tpu.memory_space<vmem>>, vector<128x128xf32>
    %cst_18 = arith.constant dense<0.000000e+00> : vector<8x128xf32>
    %35 = tpu.matmul %33, %34, %cst_18 {dimension_numbers = #tpu.dot_dimension_numbers<[1], [0], [0], [1], [0, 0, 1, 1], [], []>} : vector<8x128xf32>, vector<128x128xf32>, vector<8x128xf32> -> vector<8x128xf32>
    %c0_19 = arith.constant 0 : index
    %c0_20 = arith.constant 0 : index
    %36 = vector.load %arg5[%c0_19, %c0_20] : memref<1x128xf32, #tpu.memory_space<vmem>>, vector<1x128xf32>
    %37 = vector.broadcast %36 : vector<1x128xf32> to vector<8x128xf32>
    %38 = arith.addf %35, %37 : vector<8x128xf32>
    %cst_21 = arith.constant 0.000000e+00 : f32
    %39 = vector.broadcast %cst_21 : f32 to vector<8x128xf32>
    %40 = arith.maximumf %38, %39 : vector<8x128xf32>
    %c0_22 = arith.constant 0 : index
    %c0_23 = arith.constant 0 : index
    %41 = vector.load %arg6[%c0_22, %c0_23] : memref<1x128xf32, #tpu.memory_space<vmem>>, vector<1x128xf32>
    %cst_24 = arith.constant dense<0.000000e+00> : vector<1x8xf32>
    %42 = tpu.matmul %41, %40, %cst_24 {dimension_numbers = #tpu.dot_dimension_numbers<[1], [1], [0], [0], [0, 0, 1, 0], [], []>} : vector<1x128xf32>, vector<8x128xf32>, vector<1x8xf32> -> vector<1x8xf32>
    %c0_25 = arith.constant 0 : index
    %c0_26 = arith.constant 0 : index
    %43 = vector.load %arg7[%c0_25, %c0_26] : memref<1x1xf32, #tpu.memory_space<vmem>>, vector<1x1xf32>
    %44 = vector.broadcast %43 : vector<1x1xf32> to vector<1x8xf32>
    %45 = arith.addf %42, %44 : vector<1x8xf32>
    %c0_27 = arith.constant 0 : index
    %c0_28 = arith.constant 0 : index
    %c0_29 = arith.constant 0 : index
    %46 = vector.load %arg10[%c0_27, %c0_28, %c0_29] : memref<1x1x8xf32, #tpu.memory_space<vmem>>, vector<1x1x8xf32>
    %47 = vector.shape_cast %46 : vector<1x1x8xf32> to vector<1x8xf32>
    %48 = vector.shape_cast %45 : vector<1x8xf32> to vector<1x1x8xf32>
    tpu.vector_store %arg10[%c0_27, %c0_28, %c0_29], %48 {strides = array<i32>} : memref<1x1x8xf32, #tpu.memory_space<vmem>>, vector<1x1x8xf32>,
    return
  }
  func.func @transform_0(%arg0: i32) -> (i32, i32) {
    %c0_i32 = arith.constant 0 : i32
    %c0_i32_0 = arith.constant 0 : i32
    return %arg0, %c0_i32 : i32, i32
  }
  func.func @transform_1(%arg0: i32) -> (i32, i32) {
    %c0_i32 = arith.constant 0 : i32
    %c0_i32_0 = arith.constant 0 : i32
    %c0_i32_1 = arith.constant 0 : i32
    return %c0_i32, %c0_i32_0 : i32, i32
  }
  func.func @transform_2(%arg0: i32) -> (i32, i32) {
    %c0_i32 = arith.constant 0 : i32
    %c0_i32_0 = arith.constant 0 : i32
    %c0_i32_1 = arith.constant 0 : i32
    return %c0_i32, %c0_i32_0 : i32, i32
  }
  func.func @transform_3(%arg0: i32) -> (i32, i32) {
    %c0_i32 = arith.constant 0 : i32
    %c0_i32_0 = arith.constant 0 : i32
    %c0_i32_1 = arith.constant 0 : i32
    return %c0_i32, %c0_i32_0 : i32, i32
  }
  func.func @transform_4(%arg0: i32) -> (i32, i32) {
    %c0_i32 = arith.constant 0 : i32
    %c0_i32_0 = arith.constant 0 : i32
    %c0_i32_1 = arith.constant 0 : i32
    return %c0_i32, %c0_i32_0 : i32, i32
  }
  func.func @transform_5(%arg0: i32) -> (i32, i32) {
    %c0_i32 = arith.constant 0 : i32
    %c0_i32_0 = arith.constant 0 : i32
    %c0_i32_1 = arith.constant 0 : i32
    return %c0_i32, %c0_i32_0 : i32, i32
  }
  func.func @transform_6(%arg0: i32) -> (i32, i32) {
    %c0_i32 = arith.constant 0 : i32
    %c0_i32_0 = arith.constant 0 : i32
    %c0_i32_1 = arith.constant 0 : i32
    return %c0_i32, %c0_i32_0 : i32, i32
  }
  func.func @transform_7(%arg0: i32) -> (i32, i32) {
    %c0_i32 = arith.constant 0 : i32
    %c0_i32_0 = arith.constant 0 : i32
    %c0_i32_1 = arith.constant 0 : i32
    return %c0_i32, %c0_i32_0 : i32, i32
  }
  func.func @transform_8(%arg0: i32) -> (i32, i32) {
    %c0_i32 = arith.constant 0 : i32
    %c0_i32_0 = arith.constant 0 : i32
    %c0_i32_1 = arith.constant 0 : i32
    return %c0_i32, %c0_i32_0 : i32, i32
  }
  func.func @transform_9(%arg0: i32) -> (i32, i32, i32) {
    %c0_i32 = arith.constant 0 : i32
    %c0_i32_0 = arith.constant 0 : i32
    %c0_i32_1 = arith.constant 0 : i32
    return %arg0, %c0_i32, %c0_i32_0 : i32, i32, i32
  }
}

</mosaic_0001>

<bundles_post_ra>
// kernel: tpu_custom_call.1
= control target key start
LH: loop header
LB: loop body
LE: loop exit
PB: predicated region body
PF: predicated region fallthrough
CT: control target
= control target key end

     0   :  { %s814_s0 = inlined_call_operand.hbm [shape: f32[8,128], index: 0, kind: input, shape index: {}]   ;;  %s815_s1 = inlined_call_operand.hbm [shape: f32[128,128], index: 1, kind: input, shape index: {}]   ;;  %s816_s2 = inlined_call_operand.vmem [shape: f32[1,128], index: 2, kind: input, shape index: {}]   ;;  %s817_s3 = inlined_call_operand.hbm [shape: f32[128,128], index: 3, kind: input, shape index: {}]   ;;  %s818_s4 = inlined_call_operand.vmem [shape: f32[1,128], index: 4, kind: input, shape index: {}]   ;;  %s819_s5 = inlined_call_operand.vmem [shape: f32[1,128], index: 5, kind: input, shape index: {}]   ;;  %s820_s6 = inlined_call_operand.<no memory space> [shape: f32[1,1], index: 6, kind: input, shape index: {}]   ;;  %s821_s7 = inlined_call_operand.vmem [shape: f32[1,128], index: 7, kind: input, shape index: {}]   ;;  %s822_s8 = inlined_call_operand.vmem [shape: f32[1,128], index: 8, kind: input, shape index: {}]   ;;  %s823_s9 = inlined_call_operand.hbm [shape: f32[1,1,8], index: 9, kind: output, shape index: {}]  }
   0x1   :  { %v14_v0 = vstv %s820_s6 }
   0x2   :  { %15 = vst [vmem:[#allocation2] sm:$0x1] %v14_v0 }
   0x3   :  { %16 = vsyncpa [#allocation4], 0 }
   0x4   :  { %17 = vsyncpa [#allocation7], 0 }
   0x5   :  { %18 = vsyncpa [#allocation5], 0  ;;  %s663_s11 = smov [#allocation6]   ;;  %s569_s15 = scalar_lea.hbm %s815_s1, 2048 }
   0x6   :  { %s34_s12 = sshll.u32 %s663_s11, 4  ;;  %p570_p0 = scmp.ne.s32.totalorder %s815_s1, %s569_s15  ;;  %s35_s12 = int_to_ptr.vmem [resolvable:$true] %s34_s12 }
   0x7   :  { %p573_p1 = scmp.lt.u32.totalorder %s569_s15, %s815_s1 }
   0x9   :  { %p575_p2 = pnand %p573_p1, %p570_p0 }
   0xb   :  { %578 = shalt.err (!%p575_p2)
}
   0xc   :  { %s579_s6 = scalar_lea.vmem %s35_s12, 2048  ;;  %p584_p4 = scmp.lt.s32.totalorder %s35_s12, %s35_s12 }
   0xd   :  { %p580_p3 = scmp.ne.s32.totalorder %s35_s12, %s579_s6  ;;  %p585_p5 = scmp.lt.s32.totalorder %s579_s6, %s579_s6 }
   0xf   :  { %p586_p6 = por %p585_p5, %p584_p4 }
  0x11   :  { %p587_p7 = pnand %p586_p6, %p580_p3 }
  0x13   :  { %590 = shalt.err (!%p587_p7)
}
  0x14   :  { %s664_s20 = smov 128   ;;  %s665_s21 = smov 8  }
  0x15   :  { %40 = dma.hbm_to_vmem [thread:$0]  %s815_s1, 2048, %s35_s12, [#allocation7], %s664_s20, %s664_s20, %s665_s21  }
  0x16   :  { %s666_s24 = smov [#allocation3]   ;;  %s667_s26 = smov [#allocation8]  }
  0x17   :  { %s25_s25 = sshll.u32 %s666_s24, 4  ;;  %s48_s27 = sshll.u32 %s667_s26, 4  ;;  %s26_s25 = int_to_ptr.vmem [resolvable:$true] %s25_s25  ;;  %s49_s27 = int_to_ptr.vmem [resolvable:$true] %s48_s27 }
  0x18   :  { %s591_s30 = scalar_lea.hbm %s814_s0, 128 }
  0x19   :  { %p592_p8 = scmp.ne.s32.totalorder %s814_s0, %s591_s30  ;;  %p595_p9 = scmp.lt.u32.totalorder %s591_s30, %s814_s0 }
  0x1b   :  { %p597_p10 = pnand %p595_p9, %p592_p8 }
  0x1d   :  { %600 = shalt.err (!%p597_p10)
}
  0x1e   :  { %s601_s1 = scalar_lea.vmem %s26_s25, 128  ;;  %p606_p12 = scmp.lt.s32.totalorder %s26_s25, %s26_s25 }
  0x1f   :  { %p602_p11 = scmp.ne.s32.totalorder %s26_s25, %s601_s1  ;;  %p607_p13 = scmp.lt.s32.totalorder %s601_s1, %s601_s1 }
  0x21   :  { %p608_p0 = por %p607_p13, %p606_p12 }
  0x23   :  { %p609_p1 = pnand %p608_p0, %p602_p11 }
  0x25   :  { %612 = shalt.err (!%p609_p1)
}
  0x26   :  { %28 = dma.hbm_to_vmem [thread:$0]  %s814_s0, 128, %s26_s25, [#allocation4]  }
  0x27   :  { %s613_s18 = scalar_lea.hbm %s817_s3, 2048 }
  0x28   :  { %p614_p2 = scmp.ne.s32.totalorder %s817_s3, %s613_s18  ;;  %p617_p3 = scmp.lt.u32.totalorder %s613_s18, %s817_s3 }
  0x2a   :  { %p619_p4 = pnand %p617_p3, %p614_p2 }
  0x2c   :  { %622 = shalt.err (!%p619_p4)
}
  0x2d   :  { %s623_s24 = scalar_lea.vmem %s49_s27, 2048  ;;  %p628_p6 = scmp.lt.s32.totalorder %s49_s27, %s49_s27 }
  0x2e   :  { %p624_p5 = scmp.ne.s32.totalorder %s49_s27, %s623_s24  ;;  %p629_p7 = scmp.lt.s32.totalorder %s623_s24, %s623_s24 }
  0x30   :  { %p630_p8 = por %p629_p7, %p628_p6 }
  0x32   :  { %p631_p9 = pnand %p630_p8, %p624_p5 }
  0x34   :  { %634 = shalt.err (!%p631_p9)
}
  0x35   :  { %54 = dma.hbm_to_vmem [thread:$0]  %s817_s3, 2048, %s49_s27, [#allocation7], %s664_s20, %s664_s20, %s665_s21  }
  0x36   :  { %657 = dma.done.wait [#allocation4], 128  }
  0x37   :  { %658 = vsyncadd [#allocation4], 4294967168 }
  0x38   :  { %659 = dma.done.wait [#allocation7], 4096  }
  0x39   :  { %660 = vsyncadd [#allocation7], 4294963200  ;;  %v668_v1 = vmov 0.0|0.0   ;;  %vm669_vm0 = vmmov 0   ;;  %v670_v2 = vmov 0.0   ;;  %v75_v3 = vld [vmem:[#allocation6] sm:$0xff] }
  0x3a   :  { %507 = vmatprep.subr.bf16.mxu0 %v668_v1  ;;  %464 = vmatprep.mubr.msk.f32.mxu0 %vm669_vm0, %v670_v2  ;;  %v76_v4 = vld [vmem:[#allocation6 + $0x8] sm:$0xff]  ;;  %v77_v5 = vld [vmem:[#allocation6 + $0x10] sm:$0xff]  ;;  %v78_v7 = vld [vmem:[#allocation6 + $0x18] sm:$0xff]  ;;  %vm374_vm1 = vcmask 57344  }
  0x3b   :  { %531 = vmatprep.subr.bf16.mxu1 %v668_v1  ;;  %499 = vmatprep.mubr.msk.f32.mxu1 %vm669_vm0, %v670_v2  ;;  %v508_v6 = vpack.c.bf16 %v76_v4, %v75_v3  ;;  %v511_v8 = vpack.c.bf16 %v78_v7, %v77_v5  ;;  %v79_v9 = vld [vmem:[#allocation6 + $0x20] sm:$0xff]  ;;  %v80_v10 = vld [vmem:[#allocation6 + $0x28] sm:$0xff]  ;;  %v81_v12 = vld [vmem:[#allocation6 + $0x30] sm:$0xff] }
  0x3c   :  { %v514_v11 = vpack.c.bf16 %v80_v10, %v79_v9  ;;  %v82_v13 = vld [vmem:[#allocation6 + $0x38] sm:$0xff]  ;;  %v83_v15 = vld [vmem:[#allocation6 + $0x40] sm:$0xff]  ;;  %v84_v16 = vld [vmem:[#allocation6 + $0x48] sm:$0xff]  ;;  %v671_v10 = vmov 0  }
  0x3d   :  { %509 = vmatpush3.bf16.msra.mxu0 %v508_v6  ;;  %v517_v14 = vpack.c.bf16 %v82_v13, %v81_v12  ;;  %v520_v17 = vpack.c.bf16 %v84_v16, %v83_v15  ;;  %v85_v18 = vld [vmem:[#allocation6 + $0x50] sm:$0xff]  ;;  %v86_v19 = vld [vmem:[#allocation6 + $0x58] sm:$0xff]  ;;  %v87_v21 = vld [vmem:[#allocation6 + $0x60] sm:$0xff]  ;;  %565 = vset.pattern.permute.xlu1 %v671_v10 }
  0x3e   :  { %510 = vmatprep.subr.bf16.mxu0 %v668_v1  ;;  %v523_v20 = vpack.c.bf16 %v86_v19, %v85_v18  ;;  %v88_v22 = vld [vmem:[#allocation6 + $0x68] sm:$0xff]  ;;  %v89_v24 = vld [vmem:[#allocation6 + $0x70] sm:$0xff]  ;;  %v90_v25 = vld [vmem:[#allocation6 + $0x78] sm:$0xff]  ;;  %566 = vset.pattern.permute.xlu0 %v671_v10 }
  0x3f   :  { %v526_v23 = vpack.c.bf16 %v88_v22, %v87_v21  ;;  %v529_v26 = vpack.c.bf16 %v90_v25, %v89_v24  ;;  %v74_v27 = vld [vmem:[#allocation3] sm:$0xff]  ;;  %v199_v28 = vld [vmem:[#allocation8] sm:$0xff]  ;;  %v200_v29 = vld [vmem:[#allocation8 + $0x8] sm:$0xff] }
  0x40   :  { %v532_v30 = vpack.c.bf16 %v200_v29, %v199_v28  ;;  %v392_v31 = vld [vmem:[%s816_s2] ss:$0 sm:$0xff]  ;;  %v202_v38 = vld [vmem:[#allocation8 + $0x18] sm:$0xff]  ;;  %v203_v40 = vld [vmem:[#allocation8 + $0x20] sm:$0xff] }
  0x41   :  { %512 = vmatpush3.bf16.msra.mxu0 %v511_v8  ;;  %v201_v37 = vld [vmem:[#allocation8 + $0x10] sm:$0xff]  ;;  %v204_v41 = vld [vmem:[#allocation8 + $0x28] sm:$0xff]  ;;  %v206_v44 = vld [vmem:[#allocation8 + $0x38] sm:$0xff] }
  0x42   :  { %513 = vmatprep.subr.bf16.mxu0 %v668_v1  ;;  %533 = vmatpush3.bf16.msra.mxu1 %v532_v30  ;;  %v535_v39 = vpack.c.bf16 %v202_v38, %v201_v37  ;;  %v538_v42 = vpack.c.bf16 %v204_v41, %v203_v40  ;;  %v205_v43 = vld [vmem:[#allocation8 + $0x30] sm:$0xff]  ;;  %v207_v46 = vld [vmem:[#allocation8 + $0x40] sm:$0xff]  ;;  %v208_v47 = vld [vmem:[#allocation8 + $0x48] sm:$0xff] }
  0x43   :  { %534 = vmatprep.subr.bf16.mxu1 %v668_v1  ;;  %v541_v45 = vpack.c.bf16 %v206_v44, %v205_v43  ;;  %v544_v48 = vpack.c.bf16 %v208_v47, %v207_v46  ;;  %v209_v49 = vld [vmem:[#allocation8 + $0x50] sm:$0xff]  ;;  %v210_v50 = vld [vmem:[#allocation8 + $0x58] sm:$0xff]  ;;  %v211_v52 = vld [vmem:[#allocation8 + $0x60] sm:$0xff] }
  0x44   :  { %v547_v51 = vpack.c.bf16 %v210_v50, %v209_v49  ;;  %v212_v53 = vld [vmem:[#allocation8 + $0x68] sm:$0xff]  ;;  %v213_v55 = vld [vmem:[#allocation8 + $0x70] sm:$0xff]  ;;  %v214_v56 = vld [vmem:[#allocation8 + $0x78] sm:$0xff] }
  0x45   :  { %515 = vmatpush3.bf16.msra.mxu0 %v514_v11  ;;  %v550_v54 = vpack.c.bf16 %v212_v53, %v211_v52  ;;  %v553_v57 = vpack.c.bf16 %v214_v56, %v213_v55  ;;  %v393_v5 = vld [vmem:[%s821_s7] ss:$0 sm:$0xff] }
  0x46   :  { %516 = vmatprep.subr.bf16.mxu0 %v668_v1  ;;  %536 = vmatpush3.bf16.msra.mxu1 %v535_v39  ;;  %v294_v9 = vld [vmem:[#allocation2] sm:$0x1] }
  0x47   :  { %537 = vmatprep.subr.bf16.mxu1 %v668_v1  ;;  %297 = vperm.xlu1 %565, %v294_v9   ;;  %v395_v11 = vld [vmem:[%s818_s4] ss:$0 sm:$0xff] }
  0x48   :  { %v293_v16 = vld [vmem:[%s819_s5] sm:$0x1] }
  0x49   :  { %518 = vmatpush3.bf16.msra.mxu0 %v517_v14 }
  0x4a   :  { %519 = vmatprep.subr.bf16.mxu0 %v668_v1  ;;  %539 = vmatpush3.bf16.msra.mxu1 %v538_v42 }
  0x4b   :  { %540 = vmatprep.subr.bf16.mxu1 %v668_v1 }
  0x4d   :  { %521 = vmatpush3.bf16.msra.mxu0 %v520_v17  ;;  %v300_v17 = vlaneseq }
  0x4e   :  { %522 = vmatprep.subr.bf16.mxu0 %v668_v1  ;;  %542 = vmatpush3.bf16.msra.mxu1 %v541_v45 }
  0x4f   :  { %543 = vmatprep.subr.bf16.mxu1 %v668_v1  ;;  %v301_v18 = vshrl.u32 %v300_v17, 7 }
  0x51   :  { %524 = vmatpush3.bf16.msra.mxu0 %v523_v20  ;;  %v302_v19 = vsub.s32 0, %v301_v18 }
  0x52   :  { %525 = vmatprep.subr.bf16.mxu0 %v668_v1  ;;  %545 = vmatpush3.bf16.msra.mxu1 %v544_v48 }
  0x53   :  { %546 = vmatprep.subr.bf16.mxu1 %v668_v1 }
  0x55   :  { %527 = vmatpush3.bf16.msra.mxu0 %v526_v23 }
  0x56   :  { %528 = vmatprep.subr.bf16.mxu0 %v668_v1  ;;  %548 = vmatpush3.bf16.msra.mxu1 %v547_v51 }
  0x57   :  { %549 = vmatprep.subr.bf16.mxu1 %v668_v1 }
  0x59   :  { %530 = vmatpush3.bf16.msra.mxu0 %v529_v26 }
  0x5a   :  { %502 = vmatprep.subr.mxu0 %v670_v2  ;;  %551 = vmatpush3.bf16.msra.mxu1 %v550_v54 }
  0x5b   :  { %552 = vmatprep.subr.bf16.mxu1 %v668_v1  ;;  %v394_v1 = vld [vmem:[%s822_s8] ss:$0 sm:$0xff]  ;;  %s672_s8 = smov [#allocation9]  }
  0x5c   :  { %465 = vmatmul.mubr.f32.vlgmr.msra.gmra.mrb[0].mxu0 %v74_v27  ;;  %s382_s10 = sshll.u32 %s672_s8, 4  ;;  %s383_s10 = int_to_ptr.vmem [resolvable:$true] %s382_s10 }
  0x5d   :  { %504 = vmatprep.mubr.msk.f32.mxu0 %vm669_vm0, %v670_v2  ;;  %s635_s4 = scalar_lea.vmem %s383_s10, 16  ;;  %s639_s11 = scalar_lea.vmem %s383_s10, 32 }
  0x5e   :  { %554 = vmatpush3.bf16.msra.mxu1 %v553_v57  ;;  %p636_p10 = scmp.ne.s32.totalorder %s383_s10, %s635_s4  ;;  %p640_p11 = scmp.lt.s32.totalorder %s383_s10, %s383_s10 }
  0x5f   :  { %p641_p12 = scmp.lt.s32.totalorder %s639_s11, %s635_s4 }
  0x61   :  { %p642_p13 = por %p641_p12, %p640_p11 }
  0x63   :  { %p643_p0 = pnand %p642_p13, %p636_p10 }
  0xc6   :  { %v298_v20 = vpop.permute.xlu1 %297 }
  0xc7   :  { %v303_v21 = vrot.slane %v298_v20, %v302_v19 }
 0x12f   :  { %v164_v32 = vpop.f32.mrb[0].mxu0 }
 0x130   :  { %v165_v33 = vadd.f32 %v392_v31, %v164_v32  ;;  %v466_v34 = vpop.f32.mrb[1].mxu0 }
 0x132   :  { %v168_v35 = vmax.f32 %v165_v33, 0.0 }
 0x134   :  { %169 = vadd.xlane.f32.xlu0 %v168_v35  ;;  %v172_v36 = vmul.f32 %v168_v35, %v168_v35 }
 0x138   :  { %173 = vadd.xlane.f32.xlu0 %v172_v36 }
 0x1c1   :  { %v170_v58 = vpop.xlane.xlu0 %169 }
 0x1c2   :  { %v171_v59 = vmul.f32 0.03125, %v170_v58 }
 0x1c4   :  { %v176_v61 = vmul.f32 %v171_v59, %v171_v59  ;;  %v179_v3 = vsub.f32 %v168_v35, %v171_v59 }
 0x1c5   :  { %v174_v60 = vpop.xlane.xlu0 %173 }
 0x1c6   :  { %v175_v62 = vmul.f32 0.03125, %v174_v60 }
 0x1c8   :  { %v177_v63 = vsub.f32 %v175_v62, %v176_v61 }
 0x1ca   :  { %v178_v0 = vmax.f32 %v177_v63, 0.0 }
 0x1cc   :  { %v180_v2 = vadd.f32 1e-05, %v178_v0 }
 0x1ce   :  { %567 = vrsqrt.f32 %v180_v2 }
 0x1d8   :  { %v568_v4 = vpop.eup %567 }
 0x1d9   :  { %v182_v6 = vmul.f32 %v568_v4, %v179_v3 }
 0x1db   :  { %v190_v7 = vmul.f32 %v393_v5, %v182_v6 }
 0x1dd   :  { %v198_v8 = vadd.f32 %v394_v1, %v190_v7 }
 0x1df   :  { %500 = vmatmul.mubr.f32.vlgmr.msra.gmra.mrb[0].mxu1 %v198_v8 }
 0x2b2   :  { %v288_v12 = vpop.f32.mrb[0].mxu1 }
 0x2b3   :  { %v289_v13 = vadd.f32 %v395_v11, %v288_v12  ;;  %v501_v14 = vpop.f32.mrb[1].mxu1 }
 0x2b5   :  { %v292_v15 = vmax.f32 %v289_v13, 0.0 }
 0x2b7   :  { %503 = vmatpush3.xpose.msra.mxu0 %v292_v15 }
 0x2ba   :  { %505 = vmatmul.mubr.f32.vlgmr.msra.gmra.mrb[2].mxu0 %v293_v16 }
 0x38d   :  { %v370_v22 = vpop.f32.mrb[2].mxu0 }
 0x38e   :  { %v371_v23 = vadd.f32 %v370_v22, %v303_v21  ;;  %v506_v24 = vpop.f32.mrb[3].mxu0 }
 0x390   :  { %375 = vst.msk [vmem:[#allocation9] sm:$0x1] %vm374_vm1, %v371_v23 }
 0x391   :  { %646 = shalt.err (!%p643_p0)
}
 0x392   :  { %s647_s14 = scalar_lea.hbm %s823_s9, 16 }
 0x393   :  { %p648_p1 = scmp.ne.s32.totalorder %s823_s9, %s647_s14  ;;  %p651_p2 = scmp.lt.u32.totalorder %s647_s14, %s823_s9 }
 0x395   :  { %p653_p3 = pnand %p651_p2, %p648_p1 }
 0x397   :  { %656 = shalt.err (!%p653_p3)
}
 0x398   :  { %385 = dma.vmem_to_hbm [thread:$0]  %s383_s10, 16, %s823_s9, [#allocation5]  }
 0x399   :  { %661 = dma.done.wait [#allocation5], 16  }
 0x39a   :  { %662 = vsyncadd [#allocation5], 4294967280 }
 0x39b   :  { %389 = vsyncpa [#allocation4], 1 }
 0x39c   :  { %390 = vsyncpa [#allocation7], 1 }
 0x39d   :  { %391 = vsyncpa [#allocation5], 1 }

</bundles_post_ra>
